<compile_context>
chip_gen: v5e
topology: v5e:2x2
jax: 0.10.0
libtpu: 0.0.40
codegen_flags: <defaults>
</compile_context>

<pallas_src>
import functools

import jax
import jax.numpy as jnp
from jax.experimental import pallas as pl
from jax.experimental.pallas import tpu as pltpu

SAMPLE_LEN = 200   # T: input and output length
H1 = 50
H2 = 50
H_PAD = 128        # hidden dims 50 -> 128 (lane-dense weights; exact, padding is zero)


def _round_up(n, m):
    return (n + m - 1) // m * m


def _choose_batch_tile(batch, block_rows):
    """Pick (tile_rows, n_tiles, padded_batch).

    - tile rows are a multiple of 8 (f32 sublane granularity),
    - the tile count is kept even when >1 so ("parallel",) grid sharding balances
      v7x's two TensorCores (v5e/v6e have a single TC, where this is a no-op),
    - large default tiles (1024 rows) amortize the ~0.35us per-grid-step overhead
      and fill full MXU M-passes; VMEM per step stays in the low MiB.
    """
    b8 = _round_up(max(batch, 1), 8)
    tb = min(_round_up(max(block_rows, 8), 8), b8)
    n = -(-b8 // tb)                    # ceil div
    if n > 1 and n % 2 == 1:
        n += 1                          # even tile count -> 2-TC balance on v7x
    tb = _round_up(-(-b8 // n), 8)
    return tb, n, tb * n


def _folded_params(x, w1, w2, w3, matmul_dtype):
    """Fold the global normalization and the 0.5 tanh-argument scale into the weights.

    Module:  X_norm = X - X.min();  X_norm *= 1/X.max()   (max of the RAW X)
    Fold:    X_norm @ W1 == X @ (inv_max*W1) + (-min*inv_max) * colsum(W1)
             sigmoid(s) == 0.5*tanh(0.5*s) + 0.5  -> the 0.5 goes into every W.
    The two global reductions are sibling reductions over the same array and fuse
    into a single HBM pass under jit.
    """
    x = x.astype(jnp.float32)
    x_min = jnp.min(x)
    inv_max = 1.0 / jnp.max(x)          # max of the raw X, matching the module
    w1f = w1.astype(jnp.float32)
    w1_eff = (w1f * (0.5 * inv_max)).astype(matmul_dtype)
    b1 = (0.5 * (-x_min) * inv_max) * jnp.sum(w1f, axis=0)      # stays f32
    w2_s = (0.5 * w2.astype(jnp.float32)).astype(matmul_dtype)
    w3_s = (0.5 * w3.astype(jnp.float32)).astype(matmul_dtype)
    return w1_eff, b1, w2_s, w3_s


def footfall_kernel(x_ref, w1_ref, b1_ref, w2_ref, w3_ref, o_ref):
    # x_ref : (tb, 200)   f32 raw input rows (no lane padding)
    # w1_ref: (200, 128)  matmul dtype  = 0.5*inv_max*W1, hidden lanes zero-padded
    # b1_ref: (1, 128)    f32           = 0.5*(-min*inv_max)*colsum(W1)
    # w2_ref: (128, 128), w3_ref: (128, 200)  matmul dtype = 0.5*W2 / 0.5*W3, zero-padded
    # Padded hidden lanes give tanh(0) -> v = 0.5, which meets zero weight rows in the
    # next layer, so padding is numerically exact.  Last two sigmoids are collapsed:
    #   sigmoid(sigmoid(s) - 0.5, k=10) == 0.5*tanh(2.5*tanh(0.5*s)) + 0.5
    mm = w1_ref.dtype                                   # bf16 (MXU-native) or f32
    x = x_ref[...].astype(mm)
    s = jnp.dot(x, w1_ref[...], preferred_element_type=jnp.float32) + b1_ref[...]
    v = 0.5 * jnp.tanh(s) + 0.5
    s = jnp.dot(v.astype(mm), w2_ref[...], preferred_element_type=jnp.float32)
    v = 0.5 * jnp.tanh(s) + 0.5
    s = jnp.dot(v.astype(mm), w3_ref[...], preferred_element_type=jnp.float32)
    o_ref[...] = (0.5 * jnp.tanh(2.5 * jnp.tanh(s)) + 0.5).astype(o_ref.dtype)


def footfall_detector_forward(x, w1, w2, w3, *, block_rows=1024,
                              matmul_dtype=jnp.bfloat16, out_dtype=jnp.float32):
    """x: (B, 200) or (200,) float; W1: (200,50), W2: (50,50), W3: (50,200).

    Returns FootfallDetector.forward(x).  matmul_dtype=bf16 (default) runs the
    MXU natively with f32 accumulation; matmul_dtype=f32 gives near-bit parity.
    out_dtype=bf16 halves store bytes on HBM-bound parts (v5e) if the consumer
    only thresholds the output (process_clip uses tol=0.1).
    """
    squeeze = x.ndim == 1
    if squeeze:
        x = x[None, :]
    B, T = x.shape
    assert T == SAMPLE_LEN
    h1, h2 = w1.shape[1], w2.shape[1]
    assert w1.shape == (T, h1) and w2.shape == (h1, h2) and w3.shape == (h2, T)

    x = x.astype(jnp.float32)
    w1_eff, b1, w2_s, w3_s = _folded_params(x, w1, w2, w3, matmul_dtype)

    # Zero-pad ONLY the tiny weight hidden dims (50 -> 128).  X / O keep their
    # natural 200-wide last dim (full-extent blocks), avoiding a full extra HBM
    # read+write pad pass over X and a slice pass over O.
    w1_p = jnp.zeros((T, H_PAD), matmul_dtype).at[:, :h1].set(w1_eff)
    b1_p = jnp.zeros((1, H_PAD), jnp.float32).at[0, :h1].set(b1)
    w2_p = jnp.zeros((H_PAD, H_PAD), matmul_dtype).at[:h1, :h2].set(w2_s)
    w3_p = jnp.zeros((H_PAD, T), matmul_dtype).at[:h2, :].set(w3_s)

    tb, n_tiles, b_pad = _choose_batch_tile(B, block_rows)
    x_in = x if b_pad == B else jnp.pad(x, ((0, b_pad - B), (0, 0)))  # batch dim only

    out_p = pl.pallas_call(
        footfall_kernel,
        out_shape=jax.ShapeDtypeStruct((b_pad, T), out_dtype),
        grid_spec=pltpu.PrefetchScalarGridSpec(
            num_scalar_prefetch=0,
            grid=(n_tiles,),
            in_specs=[
                pl.BlockSpec((tb, T), lambda i: (i, 0)),         # X rows (pipelined)
                pl.BlockSpec((T, H_PAD), lambda i: (0, 0)),      # W1_eff (grid-invariant)
                pl.BlockSpec((1, H_PAD), lambda i: (0, 0)),      # bias
                pl.BlockSpec((H_PAD, H_PAD), lambda i: (0, 0)),  # W2
                pl.BlockSpec((H_PAD, T), lambda i: (0, 0)),      # W3
            ],
            out_specs=pl.BlockSpec((tb, T), lambda i: (i, 0)),
        ),
        compiler_params=pltpu.CompilerParams(
            dimension_semantics=("parallel",),       # shards the batch grid across TCs on v7x
            vmem_limit_bytes=32 * 1024 * 1024,       # plenty of headroom on every generation
        ),
    )(x_in, w1_p, b1_p, w2_p, w3_p)

    out = out_p if b_pad == B else out_p[:B]
    return out[0] if squeeze else out


def reference_forward(x, w1, w2, w3):
    """Pure-JAX f32 mirror of FootfallDetector.forward (exact module semantics)."""
    x = jnp.asarray(x, jnp.float32)
    x_norm = (x - jnp.min(x)) * (1.0 / jnp.max(x))   # max of the RAW X, as in the module
    v = x_norm
    for w in (w1, w2, w3):
        v = 1.0 / (1.0 + jnp.exp(-jnp.dot(v, w)))
    return 1.0 / (1.0 + jnp.exp(-10.0 * (v - 0.5)))


def replica_reference(x, w1, w2, w3, matmul_dtype):
    """Pure-JAX replica using the kernel's exact operand precision / weight folding."""
    w1_eff, b1, w2_s, w3_s = _folded_params(x, w1, w2, w3, matmul_dtype)
    v = jnp.asarray(x, jnp.float32)
    s = jnp.dot(v.astype(matmul_dtype), w1_eff, preferred_element_type=jnp.float32) + b1
    v = 0.5 * jnp.tanh(s) + 0.5
    s = jnp.dot(v.astype(matmul_dtype), w2_s, preferred_element_type=jnp.float32)
    v = 0.5 * jnp.tanh(s) + 0.5
    s = jnp.dot(v.astype(matmul_dtype), w3_s, preferred_element_type=jnp.float32)
    return 0.5 * jnp.tanh(2.5 * jnp.tanh(s)) + 0.5


if __name__ == "__main__":
    key = jax.random.PRNGKey(0)
    k_x, k_w1, k_w2, k_w3 = jax.random.split(key, 4)

    B = 100
    # Inputs are normalized paw heights in the original pipeline -> [0, 0.635].
    x = jax.random.uniform(k_x, (B, SAMPLE_LEN), dtype=jnp.float32,
                           minval=0.0, maxval=0.635)
    w1 = jax.random.normal(k_w1, (SAMPLE_LEN, H1), dtype=jnp.float32)
    w2 = jax.random.normal(k_w2, (H1, H2), dtype=jnp.float32)
    w3 = jax.random.normal(k_w3, (H2, SAMPLE_LEN), dtype=jnp.float32)

    # (1) Exact-precision (f32) path with a deliberately small tile: exercises the
    #     multi-step grid (even tile count), batch-pad tail and row slice-back, and
    #     validates the normalization fold, hidden-lane padding and the collapsed
    #     tanh activations against the exact module semantics.  (Correctness stress
    #     only — the performance default is block_rows=1024 / bf16.)
    fwd_f32 = jax.jit(functools.partial(footfall_detector_forward,
                                        block_rows=32, matmul_dtype=jnp.float32))
    out_f32 = jax.block_until_ready(fwd_f32(x, w1, w2, w3))
    ref = reference_forward(x, w1, w2, w3)
    assert out_f32.shape == (B, SAMPLE_LEN)
    assert jnp.allclose(out_f32, ref, atol=1e-4, rtol=1e-4), "f32 path mismatch"

    # (2) Default fast path: bf16 MXU operands / f32 accumulation, big batch tile.
    #     Validated against a pure-JAX replica with identical operand precision
    #     (bf16 quantization itself can move near-0.5 outputs by ~1e-2 relative to
    #     pure f32, immaterial for the 0.1 threshold used downstream in process_clip).
    fwd = jax.jit(footfall_detector_forward)
    out = jax.block_until_ready(fwd(x, w1, w2, w3))
    ref_bf16 = replica_reference(x, w1, w2, w3, jnp.bfloat16)
    assert out.shape == (B, SAMPLE_LEN)
    assert jnp.allclose(out, ref_bf16, atol=2e-3, rtol=2e-3), "bf16 path mismatch"

    print("KERNEL_OK")
</pallas_src>

<mosaic_0001>
module attributes {stable_mosaic.version = 11 : i64} {
  func.func @footfall_kernel(%arg0: i32, %arg1: memref<32x200xf32, #tpu.memory_space<vmem>>, %arg2: memref<200x128xf32, #tpu.memory_space<vmem>>, %arg3: memref<1x128xf32, #tpu.memory_space<vmem>>, %arg4: memref<128x128xf32, #tpu.memory_space<vmem>>, %arg5: memref<128x200xf32, #tpu.memory_space<vmem>>, %arg6: memref<32x200xf32, #tpu.memory_space<vmem>>) attributes {dimension_semantics = [#tpu.dimension_semantics<parallel>], iteration_bounds = array<i64: 4>, scalar_prefetch = 0 : i64, scratch_operands = 0 : i64, tpu.core_type = #tpu.core_type<tc>, window_params = [{transform_indices = @transform_0, window_bounds = array<i64: 32, 200>}, {pipeline_mode = #tpu.pipeline_mode<synchronous>, transform_indices = @transform_1, window_bounds = array<i64: 200, 128>}, {pipeline_mode = #tpu.pipeline_mode<synchronous>, transform_indices = @transform_2, window_bounds = array<i64: 1, 128>}, {pipeline_mode = #tpu.pipeline_mode<synchronous>, transform_indices = @transform_3, window_bounds = array<i64: 128, 128>}, {pipeline_mode = #tpu.pipeline_mode<synchronous>, transform_indices = @transform_4, window_bounds = array<i64: 128, 200>}, {transform_indices = @transform_5, window_bounds = array<i64: 32, 200>}]} {
    %c0 = arith.constant 0 : index
    %c0_0 = arith.constant 0 : index
    %0 = vector.load %arg1[%c0, %c0_0] : memref<32x200xf32, #tpu.memory_space<vmem>>, vector<32x200xf32>
    %c0_1 = arith.constant 0 : index
    %c0_2 = arith.constant 0 : index
    %1 = vector.load %arg2[%c0_1, %c0_2] : memref<200x128xf32, #tpu.memory_space<vmem>>, vector<200x128xf32>
    %cst = arith.constant dense<0.000000e+00> : vector<32x128xf32>
    %2 = tpu.matmul %0, %1, %cst {dimension_numbers = #tpu.dot_dimension_numbers<[1], [0], [0], [1], [0, 0, 1, 1], [], []>} : vector<32x200xf32>, vector<200x128xf32>, vector<32x128xf32> -> vector<32x128xf32>
    %c0_3 = arith.constant 0 : index
    %c0_4 = arith.constant 0 : index
    %3 = vector.load %arg3[%c0_3, %c0_4] : memref<1x128xf32, #tpu.memory_space<vmem>>, vector<1x128xf32>
    %4 = vector.broadcast %3 : vector<1x128xf32> to vector<32x128xf32>
    %5 = arith.addf %2, %4 : vector<32x128xf32>
    %6 = math.tanh %5 : vector<32x128xf32>
    %cst_5 = arith.constant 5.000000e-01 : f32
    %7 = vector.broadcast %cst_5 : f32 to vector<32x128xf32>
    %8 = arith.mulf %7, %6 : vector<32x128xf32>
    %cst_6 = arith.constant 5.000000e-01 : f32
    %9 = vector.broadcast %cst_6 : f32 to vector<32x128xf32>
    %10 = arith.addf %8, %9 : vector<32x128xf32>
    %c0_7 = arith.constant 0 : index
    %c0_8 = arith.constant 0 : index
    %11 = vector.load %arg4[%c0_7, %c0_8] : memref<128x128xf32, #tpu.memory_space<vmem>>, vector<128x128xf32>
    %cst_9 = arith.constant dense<0.000000e+00> : vector<32x128xf32>
    %12 = tpu.matmul %10, %11, %cst_9 {dimension_numbers = #tpu.dot_dimension_numbers<[1], [0], [0], [1], [0, 0, 1, 1], [], []>} : vector<32x128xf32>, vector<128x128xf32>, vector<32x128xf32> -> vector<32x128xf32>
    %13 = math.tanh %12 : vector<32x128xf32>
    %cst_10 = arith.constant 5.000000e-01 : f32
    %14 = vector.broadcast %cst_10 : f32 to vector<32x128xf32>
    %15 = arith.mulf %14, %13 : vector<32x128xf32>
    %cst_11 = arith.constant 5.000000e-01 : f32
    %16 = vector.broadcast %cst_11 : f32 to vector<32x128xf32>
    %17 = arith.addf %15, %16 : vector<32x128xf32>
    %c0_12 = arith.constant 0 : index
    %c0_13 = arith.constant 0 : index
    %18 = vector.load %arg5[%c0_12, %c0_13] : memref<128x200xf32, #tpu.memory_space<vmem>>, vector<128x200xf32>
    %cst_14 = arith.constant dense<0.000000e+00> : vector<32x200xf32>
    %19 = tpu.matmul %17, %18, %cst_14 {dimension_numbers = #tpu.dot_dimension_numbers<[1], [0], [0], [1], [0, 0, 1, 1], [], []>} : vector<32x128xf32>, vector<128x200xf32>, vector<32x200xf32> -> vector<32x200xf32>
    %20 = math.tanh %19 : vector<32x200xf32>
    %cst_15 = arith.constant 2.500000e+00 : f32
    %21 = vector.broadcast %cst_15 : f32 to vector<32x200xf32>
    %22 = arith.mulf %21, %20 : vector<32x200xf32>
    %23 = math.tanh %22 : vector<32x200xf32>
    %cst_16 = arith.constant 5.000000e-01 : f32
    %24 = vector.broadcast %cst_16 : f32 to vector<32x200xf32>
    %25 = arith.mulf %24, %23 : vector<32x200xf32>
    %cst_17 = arith.constant 5.000000e-01 : f32
    %26 = vector.broadcast %cst_17 : f32 to vector<32x200xf32>
    %27 = arith.addf %25, %26 : vector<32x200xf32>
    %c0_18 = arith.constant 0 : index
    %c0_19 = arith.constant 0 : index
    %28 = vector.load %arg6[%c0_18, %c0_19] : memref<32x200xf32, #tpu.memory_space<vmem>>, vector<32x200xf32>
    tpu.vector_store %arg6[%c0_18, %c0_19], %27 {strides = array<i32>} : memref<32x200xf32, #tpu.memory_space<vmem>>, vector<32x200xf32>,
    return
  }
  func.func @transform_0(%arg0: i32) -> (i32, i32) {
    %c0_i32 = arith.constant 0 : i32
    %c0_i32_0 = arith.constant 0 : i32
    return %arg0, %c0_i32 : i32, i32
  }
  func.func @transform_1(%arg0: i32) -> (i32, i32) {
    %c0_i32 = arith.constant 0 : i32
    %c0_i32_0 = arith.constant 0 : i32
    %c0_i32_1 = arith.constant 0 : i32
    return %c0_i32, %c0_i32_0 : i32, i32
  }
  func.func @transform_2(%arg0: i32) -> (i32, i32) {
    %c0_i32 = arith.constant 0 : i32
    %c0_i32_0 = arith.constant 0 : i32
    %c0_i32_1 = arith.constant 0 : i32
    return %c0_i32, %c0_i32_0 : i32, i32
  }
  func.func @transform_3(%arg0: i32) -> (i32, i32) {
    %c0_i32 = arith.constant 0 : i32
    %c0_i32_0 = arith.constant 0 : i32
    %c0_i32_1 = arith.constant 0 : i32
    return %c0_i32, %c0_i32_0 : i32, i32
  }
  func.func @transform_4(%arg0: i32) -> (i32, i32) {
    %c0_i32 = arith.constant 0 : i32
    %c0_i32_0 = arith.constant 0 : i32
    %c0_i32_1 = arith.constant 0 : i32
    return %c0_i32, %c0_i32_0 : i32, i32
  }
  func.func @transform_5(%arg0: i32) -> (i32, i32) {
    %c0_i32 = arith.constant 0 : i32
    %c0_i32_0 = arith.constant 0 : i32
    return %arg0, %c0_i32 : i32, i32
  }
}

</mosaic_0001>

<bundles_post_ra>
// kernel: footfall_detector_forward.1
= control target key start
LH: loop header
LB: loop body
LE: loop exit
PB: predicated region body
PF: predicated region fallthrough
CT: control target
= control target key end

     0   :  { %s736_s18 = smov 0   ;;  %s1016_s0 = inlined_call_operand.vmem [shape: f32[128,200], index: 0, kind: input, shape index: {}]   ;;  %s1017_s1 = inlined_call_operand.vmem [shape: f32[200,128], index: 1, kind: input, shape index: {}]   ;;  %s1018_s2 = inlined_call_operand.vmem [shape: f32[1,128], index: 2, kind: input, shape index: {}]   ;;  %s1019_s3 = inlined_call_operand.vmem [shape: f32[128,128], index: 3, kind: input, shape index: {}]   ;;  %s1020_s4 = inlined_call_operand.vmem [shape: f32[128,200], index: 4, kind: input, shape index: {}]   ;;  %s1021_s5 = inlined_call_operand.vmem [shape: f32[128,200], index: 5, kind: output, shape index: {}]  }
   0x1 LB: > { %s606_s19 = sadd.s32 4294967295, %s704_s18   ;;  %p610_p0 = scmp.ge.s32.totalorder %s704_s18, 1  ;;  %s704_s18 = sphi %s736_s18, %s15_s18  }
   0x2   : > { %p189_p1 = scmp.lt.s32.totalorder %s704_s18, 5 }
   0x4   : > { %p190_p2 = pnand %p610_p0, %p189_p1 }
   0x5   : > { %s611_s30 = sshll.u32 (!%p190_p2), %s606_s19, 2 }
   0x6   : > { %193 = sbr.rel (%p190_p2) target bundleno = 504 (0x1f8), region = 40  ;;  %p220_p3 = scmp.lt.s32.totalorder (!%p190_p2), %s611_s30, 15 }
   0xb   : > { %v256_v0 = vld [vmem:[%s1017_s1 + $0x78] sm:$0xff]  ;;  %v255_v1 = vld [vmem:[%s1017_s1 + $0x70] sm:$0xff]  ;;  %v254_v2 = vld [vmem:[%s1017_s1 + $0x68] sm:$0xff]  ;;  %s1023_s30 = smov (!%p220_p3, %s611_s30), 15  ;;  %vm270_vm0 = vcmask 588800  }
   0xc   : > { %283 = vmatpush.msra.mxu0 %v256_v0  ;;  %v265_v3 = vld [vmem:[%s1017_s1 + $0xc0] sm:$0xff]  ;;  %v264_v4 = vld [vmem:[%s1017_s1 + $0xb8] sm:$0xff]  ;;  %v263_v6 = vld [vmem:[%s1017_s1 + $0xb0] sm:$0xff]  ;;  %s623_s29 = sshll.u32 %s1023_s30, 4 }
   0xd   : > { %v253_v5 = vld [vmem:[%s1017_s1 + $0x60] sm:$0xff]  ;;  %319 = vmatpush.msra.mxu1 %v265_v3  ;;  %v252_v7 = vld [vmem:[%s1017_s1 + $0x58] sm:$0xff]  ;;  %v262_v8 = vld [vmem:[%s1017_s1 + $0xa8] sm:$0xff]  ;;  %s806_s12 = scalar_lea.vmem %s1016_s0, %s623_s29  ;;  %s999_s19 = scalar_lea.vmem %s1021_s5, %s623_s29 }
   0xe   : > { %284 = vmatpush.msra.mxu0 %v255_v1  ;;  %v251_v9 = vld [vmem:[%s1017_s1 + $0x50] sm:$0xff]  ;;  %v261_v10 = vld [vmem:[%s1017_s1 + $0xa0] sm:$0xff]  ;;  %v250_v11 = vld [vmem:[%s1017_s1 + $0x48] sm:$0xff] }
   0xf   : > { %320 = vmatpush.msra.mxu1 %v264_v4  ;;  %v260_v12 = vld [vmem:[%s1017_s1 + $0x98] sm:$0xff]  ;;  %v249_v13 = vld [vmem:[%s1017_s1 + $0x40] sm:$0xff]  ;;  %v259_v14 = vld [vmem:[%s1017_s1 + $0x90] sm:$0xff] }
  0x10   : > { %285 = vmatpush.msra.mxu0 %v254_v2  ;;  %v248_v15 = vld [vmem:[%s1017_s1 + $0x38] sm:$0xff]  ;;  %v258_v16 = vld [vmem:[%s1017_s1 + $0x88] sm:$0xff]  ;;  %v247_v17 = vld [vmem:[%s1017_s1 + $0x30] sm:$0xff] }
  0x11   : > { %321 = vmatpush.msra.mxu1 %v263_v6  ;;  %v257_v18 = vld [vmem:[%s1017_s1 + $0x80] sm:$0xff]  ;;  %v246_v19 = vld [vmem:[%s1017_s1 + $0x28] sm:$0xff]  ;;  %v244_v22 = vld [vmem:[%s1017_s1 + $0x18] sm:$0xff] }
  0x12   : > { %286 = vmatpush.msra.mxu0 %v253_v5  ;;  %v234_v20 = vld [vmem:[%s806_s12 + $0x8] sm:$0xff]  ;;  %v245_v21 = vld [vmem:[%s1017_s1 + $0x20] sm:$0xff]  ;;  %v243_v23 = vld [vmem:[%s1017_s1 + $0x10] sm:$0xff] }
  0x13   : > { %322 = vmatpush.msra.mxu1 %v262_v8  ;;  %v368_v24 = vld [vmem:[%s1019_s3 + $0x78] sm:$0xff]  ;;  %v367_v25 = vld [vmem:[%s1019_s3 + $0x70] sm:$0xff]  ;;  %v242_v26 = vld [vmem:[%s1017_s1 + $0x8] sm:$0xff] }
  0x14   : > { %287 = vmatpush.msra.mxu0 %v252_v7  ;;  %369 = vmatpush.msra.mxu2 %v368_v24  ;;  %v236_v27 = vld [vmem:[%s806_s12 + $0x18] sm:$0xff]  ;;  %v366_v28 = vld [vmem:[%s1019_s3 + $0x68] sm:$0xff]  ;;  %v241_v29 = vld [vmem:[%s1017_s1] sm:$0xff] }
  0x15   : > { %323 = vmatpush.msra.mxu1 %v261_v10  ;;  %v233_v30 = vld [vmem:[%s806_s12] sm:$0xff]  ;;  %v364_v32 = vld [vmem:[%s1019_s3 + $0x58] sm:$0xff]  ;;  %v363_v33 = vld [vmem:[%s1019_s3 + $0x50] sm:$0xff] }
  0x16   : > { %288 = vmatpush.msra.mxu0 %v251_v9  ;;  %370 = vmatpush.msra.mxu2 %v367_v25  ;;  %v365_v31 = vld [vmem:[%s1019_s3 + $0x60] sm:$0xff]  ;;  %v238_v34 = vld [vmem:[%s806_s12 + $0x28] sm:$0xff]  ;;  %v235_v36 = vld [vmem:[%s806_s12 + $0x10] sm:$0xff] }
  0x17   : > { %324 = vmatpush.msra.mxu1 %v260_v12  ;;  %v362_v35 = vld [vmem:[%s1019_s3 + $0x48] sm:$0xff]  ;;  %v361_v37 = vld [vmem:[%s1019_s3 + $0x40] sm:$0xff]  ;;  %v240_v38 = vld [vmem:[%s806_s12 + $0x38] sm:$0xff] }
  0x18   : > { %289 = vmatpush.msra.mxu0 %v250_v11  ;;  %371 = vmatpush.msra.mxu2 %v366_v28  ;;  %v237_v39 = vld [vmem:[%s806_s12 + $0x20] sm:$0xff]  ;;  %v239_v40 = vld [vmem:[%s806_s12 + $0x30] sm:$0xff]  ;;  %v360_v41 = vld [vmem:[%s1019_s3 + $0x38] sm:$0xff] }
  0x19   : > { %325 = vmatpush.msra.mxu1 %v259_v14  ;;  %v359_v42 = vld [vmem:[%s1019_s3 + $0x30] sm:$0xff]  ;;  %v358_v43 = vld [vmem:[%s1019_s3 + $0x28] sm:$0xff]  ;;  %v357_v44 = vld [vmem:[%s1019_s3 + $0x20] sm:$0xff] }
  0x1a   : > { %290 = vmatpush.msra.mxu0 %v249_v13  ;;  %372 = vmatpush.msra.mxu2 %v365_v31  ;;  %v356_v45 = vld [vmem:[%s1019_s3 + $0x18] sm:$0xff]  ;;  %v355_v46 = vld [vmem:[%s1019_s3 + $0x10] sm:$0xff]  ;;  %v354_v47 = vld [vmem:[%s1019_s3 + $0x8] sm:$0xff] }
  0x1b   : > { %326 = vmatpush.msra.mxu1 %v258_v16  ;;  %v353_v48 = vld [vmem:[%s1019_s3] sm:$0xff]  ;;  %v440_v56 = vld [vmem:[%s1020_s4 + $0xf0] sm:$0xff]  ;;  %v441_v57 = vld [vmem:[%s1020_s4 + $0xf8] sm:$0xff] }
  0x1c   : > { %291 = vmatpush.msra.mxu0 %v248_v15  ;;  %373 = vmatpush.msra.mxu2 %v364_v32  ;;  %v892_v50 = vld [vmem:[%s1018_s2] ss:$0 sm:$0xff]  ;;  %v439_v60 = vld [vmem:[%s1020_s4 + $0xe8] sm:$0xff]  ;;  %v436_v61 = vld [vmem:[%s1020_s4 + $0xd0] sm:$0xff] }
  0x1d   : > { %327 = vmatpush.msra.mxu1 %v257_v18  ;;  %v438_v58 = vld [vmem:[%s1020_s4 + $0xe0] sm:$0xff]  ;;  %442 = vmatpush.msra.mxu3 %v440_v56  ;;  %v437_v62 = vld [vmem:[%s1020_s4 + $0xd8] sm:$0xff]  ;;  %v435_v3 = vld [vmem:[%s1020_s4 + $0xc8] sm:$0xff] }
  0x1e   : > { %292 = vmatpush.msra.mxu0 %v247_v17  ;;  %617 = vmatmul.msk.f32.vlgmr.msra.gmra.mxu1 %vm270_vm0, %v234_v20  ;;  %v434_v2 = vld [vmem:[%s1020_s4 + $0xc0] sm:$0xff]  ;;  %v432_v6 = vld [vmem:[%s1020_s4 + $0xb0] sm:$0xff]  ;;  %v433_v7 = vld [vmem:[%s1020_s4 + $0xb8] sm:$0xff] }
  0x1f   : > { %374 = vmatpush.msra.mxu2 %v363_v33  ;;  %625 = vmatpush.msrb.mxu1 %v441_v57  ;;  %v430_v9 = vld [vmem:[%s1020_s4 + $0xa0] sm:$0xff]  ;;  %v431_v10 = vld [vmem:[%s1020_s4 + $0xa8] sm:$0xff]  ;;  %v428_v12 = vld [vmem:[%s1020_s4 + $0x90] sm:$0xff] }
  0x20   : > { %293 = vmatpush.msra.mxu0 %v246_v19  ;;  %443 = vmatpush.msra.mxu3 %v438_v58  ;;  %v429_v13 = vld [vmem:[%s1020_s4 + $0x98] sm:$0xff]  ;;  %v426_v17 = vld [vmem:[%s1020_s4 + $0x80] sm:$0xff]  ;;  %v427_v18 = vld [vmem:[%s1020_s4 + $0x88] sm:$0xff] }
  0x21   : > { %375 = vmatpush.msra.mxu2 %v362_v35  ;;  %626 = vmatpush.msrb.mxu1 %v439_v60  ;;  %v424_v20 = vld [vmem:[%s1020_s4 + $0x70] sm:$0xff]  ;;  %v422_v24 = vld [vmem:[%s1020_s4 + $0x60] sm:$0xff]  ;;  %v423_v25 = vld [vmem:[%s1020_s4 + $0x68] sm:$0xff] }
  0x22   : > { %294 = vmatpush.msra.mxu0 %v245_v21  ;;  %444 = vmatpush.msra.mxu3 %v436_v61  ;;  %v425_v21 = vld [vmem:[%s1020_s4 + $0x78] sm:$0xff] }
  0x23   : > { %376 = vmatpush.msra.mxu2 %v361_v37  ;;  %627 = vmatpush.msrb.mxu1 %v437_v62  ;;  %v421_v35 = vld [vmem:[%s1020_s4 + $0x58] sm:$0xff]  ;;  %v419_v37 = vld [vmem:[%s1020_s4 + $0x48] sm:$0xff] }
  0x24   : > { %295 = vmatpush.msra.mxu0 %v244_v22  ;;  %445 = vmatpush.msra.mxu3 %v434_v2 }
  0x25   : > { %377 = vmatpush.msra.mxu2 %v360_v41  ;;  %628 = vmatpush.msrb.mxu1 %v435_v3  ;;  %v415_v41 = vld [vmem:[%s1020_s4 + $0x28] sm:$0xff] }
  0x26   : > { %296 = vmatpush.msra.mxu0 %v243_v23  ;;  %618 = vmatmul.msk.f32.gmra.mxu1 %vm270_vm0, %v236_v27 }
  0x27   : > { %378 = vmatpush.msra.mxu2 %v359_v42  ;;  %446 = vmatpush.msra.mxu3 %v432_v6  ;;  %v412_v42 = vld [vmem:[%s1020_s4 + $0x10] sm:$0xff] }
  0x28   : > { %297 = vmatpush.msra.mxu0 %v242_v26  ;;  %629 = vmatpush.msrb.mxu1 %v433_v7 }
  0x29   : > { %379 = vmatpush.msra.mxu2 %v358_v43  ;;  %447 = vmatpush.msra.mxu3 %v430_v9  ;;  %v413_v43 = vld [vmem:[%s1020_s4 + $0x18] sm:$0xff] }
  0x2a   : > { %298 = vmatpush.msra.mxu0 %v241_v29  ;;  %630 = vmatpush.msrb.mxu1 %v431_v10 }
  0x2b   : > { %299 = vmatmul.f32.vlgmr.msra.gmra.mxu0 %v233_v30  ;;  %380 = vmatpush.msra.mxu2 %v357_v44  ;;  %v410_v44 = vld [vmem:[%s1020_s4] sm:$0xff] }
  0x2c   : > { %471 = vmatpush.msrb.mxu0 %v441_v57  ;;  %448 = vmatpush.msra.mxu3 %v428_v12 }
  0x2d   : > { %381 = vmatpush.msra.mxu2 %v356_v45  ;;  %631 = vmatpush.msrb.mxu1 %v429_v13  ;;  %v411_v45 = vld [vmem:[%s1020_s4 + $0x8] sm:$0xff] }
  0x2e   : > { %619 = vmatmul.msk.f32.gmra.mxu1 %vm270_vm0, %v238_v34  ;;  %472 = vmatpush.msrb.mxu0 %v439_v60  ;;  %v420_v34 = vld [vmem:[%s1020_s4 + $0x50] sm:$0xff] }
  0x2f   : > { %382 = vmatpush.msra.mxu2 %v355_v46  ;;  %449 = vmatpush.msra.mxu3 %v426_v17 }
  0x30   : > { %473 = vmatpush.msrb.mxu0 %v437_v62  ;;  %632 = vmatpush.msrb.mxu1 %v427_v18 }
  0x31   : > { %383 = vmatpush.msra.mxu2 %v354_v47  ;;  %450 = vmatpush.msra.mxu3 %v424_v20 }
  0x32   : > { %474 = vmatpush.msrb.mxu0 %v435_v3  ;;  %633 = vmatpush.msrb.mxu1 %v425_v21 }
  0x33   : > { %302 = vmatmul.f32.gmra.mxu0 %v235_v36  ;;  %384 = vmatpush.msra.mxu2 %v353_v48  ;;  %v418_v36 = vld [vmem:[%s1020_s4 + $0x40] sm:$0xff] }
  0x34   : > { %475 = vmatpush.msrb.mxu0 %v433_v7  ;;  %451 = vmatpush.msra.mxu3 %v422_v24 }
  0x35   : > { %634 = vmatpush.msrb.mxu1 %v423_v25 }
  0x36   : > { %620 = vmatmul.msk.f32.gmra.mxu1 %vm270_vm0, %v240_v38  ;;  %476 = vmatpush.msrb.mxu0 %v431_v10  ;;  %v416_v38 = vld [vmem:[%s1020_s4 + $0x30] sm:$0xff] }
  0x37   : > { %452 = vmatpush.msra.mxu3 %v420_v34  ;;  %635 = vmatpush.msrb.mxu1 %v421_v35 }
  0x38   : > { %477 = vmatpush.msrb.mxu0 %v429_v13 }
  0x39   : > { %453 = vmatpush.msra.mxu3 %v418_v36  ;;  %636 = vmatpush.msrb.mxu1 %v419_v37 }
  0x3a   : > { %478 = vmatpush.msrb.mxu0 %v427_v18 }
  0x3b   : > { %305 = vmatmul.f32.gmra.mxu0 %v237_v39  ;;  %v417_v39 = vld [vmem:[%s1020_s4 + $0x38] sm:$0xff]  ;;  %454 = vmatpush.msra.mxu3 %v416_v38 }
  0x3c   : > { %479 = vmatpush.msrb.mxu0 %v425_v21  ;;  %637 = vmatpush.msrb.mxu1 %v417_v39 }
  0x3e   : > { %480 = vmatpush.msrb.mxu0 %v423_v25  ;;  %638 = vmatpush.msrb.mxu1 %v415_v41 }
  0x40   : > { %481 = vmatpush.msrb.mxu0 %v421_v35  ;;  %639 = vmatpush.msrb.mxu1 %v413_v43 }
  0x42   : > { %482 = vmatpush.msrb.mxu0 %v419_v37  ;;  %640 = vmatpush.msrb.mxu1 %v411_v45 }
  0x43   : > { %308 = vmatmul.f32.gmra.mxu0 %v239_v40  ;;  %v414_v40 = vld [vmem:[%s1020_s4 + $0x20] sm:$0xff] }
  0x44   : > { %483 = vmatpush.msrb.mxu0 %v417_v39  ;;  %455 = vmatpush.msra.mxu3 %v414_v40 }
  0x46   : > { %484 = vmatpush.msrb.mxu0 %v415_v41  ;;  %456 = vmatpush.msra.mxu3 %v412_v42 }
  0x48   : > { %485 = vmatpush.msrb.mxu0 %v413_v43  ;;  %457 = vmatpush.msra.mxu3 %v410_v44 }
  0x4a   : > { %486 = vmatpush.msrb.mxu0 %v411_v45 }
  0x9b   : > { %v329_v49 = vpop.f32.mrf.mxu1 }
  0xa3   : > { %v332_v54 = vpop.f32.mrf.mxu1 }
  0xa8   : > { %v300_v51 = vpop.f32.mrf.mxu0 }
  0xa9   : > { %v301_v52 = vadd.f32 %v892_v50, %v300_v51 }
  0xab   : > { %v330_v53 = vadd.f32 %v329_v49, %v301_v52  ;;  %v335_v5 = vpop.f32.mrf.mxu1 }
  0xad   : > { %650 = vtanh.f32 %v330_v53 }
  0xb0   : > { %v303_v55 = vpop.f32.mrf.mxu0 }
  0xb1   : > { %v304_v59 = vadd.f32 %v892_v50, %v303_v55 }
  0xb3   : > { %v651_v63 = vpop.eup %650  ;;  %v333_v0 = vadd.f32 %v332_v54, %v304_v59  ;;  %v338_v23 = vpop.f32.mrf.mxu1 }
  0xb4   : > { %v345_v1 = vmul.f32 0.5, %v651_v63 }
  0xb5   : > { %652 = vtanh.f32 %v333_v0 }
  0xb6   : > { %v349_v4 = vadd.f32 0.5, %v345_v1 }
  0xb8   : > { %v306_v8 = vpop.f32.mrf.mxu0  ;;  %385 = vmatmul.f32.vlgmr.msra.gmra.mxu2 %v349_v4 }
  0xb9   : > { %v307_v11 = vadd.f32 %v892_v50, %v306_v8 }
  0xbb   : > { %v653_v14 = vpop.eup %652  ;;  %v336_v15 = vadd.f32 %v335_v5, %v307_v11 }
  0xbc   : > { %v346_v16 = vmul.f32 0.5, %v653_v14 }
  0xbd   : > { %654 = vtanh.f32 %v336_v15 }
  0xbe   : > { %v350_v19 = vadd.f32 0.5, %v346_v16 }
  0xc0   : > { %v309_v22 = vpop.f32.mrf.mxu0  ;;  %388 = vmatmul.f32.gmra.mxu2 %v350_v19 }
  0xc1   : > { %v310_v26 = vadd.f32 %v892_v50, %v309_v22 }
  0xc3   : > { %v655_v27 = vpop.eup %654  ;;  %v339_v28 = vadd.f32 %v338_v23, %v310_v26 }
  0xc4   : > { %v347_v29 = vmul.f32 0.5, %v655_v27 }
  0xc5   : > { %656 = vtanh.f32 %v339_v28 }
  0xc6   : > { %v351_v30 = vadd.f32 0.5, %v347_v29 }
  0xc8   : > { %391 = vmatmul.f32.gmra.mxu2 %v351_v30 }
  0xcb   : > { %v657_v31 = vpop.eup %656 }
  0xcc   : > { %v348_v32 = vmul.f32 0.5, %v657_v31 }
  0xce   : > { %v352_v33 = vadd.f32 0.5, %v348_v32 }
  0xd0   : > { %394 = vmatmul.f32.gmra.mxu2 %v352_v33 }
 0x13b   : > { %v386_v46 = vpop.f32.mrf.mxu2 }
 0x13c   : > { %658 = vtanh.f32 %v386_v46 }
 0x142   : > { %v659_v47 = vpop.eup %658 }
 0x143   : > { %v389_v48 = vpop.f32.mrf.mxu2  ;;  %v402_v49 = vmul.f32 0.5, %v659_v47 }
 0x144   : > { %660 = vtanh.f32 %v389_v48 }
 0x145   : > { %v406_v50 = vadd.f32 0.5, %v402_v49 }
 0x147   : > { %458 = vmatmul.f32.vlgmr.msra.gmra.mxu3 %v406_v50  ;;  %487 = vmatmul.f32.vlgmr.msrb.gmra.mxu0 %v406_v50 }
 0x14a   : > { %v661_v51 = vpop.eup %660 }
 0x14b   : > { %v392_v52 = vpop.f32.mrf.mxu2  ;;  %v403_v53 = vmul.f32 0.5, %v661_v51 }
 0x14c   : > { %662 = vtanh.f32 %v392_v52 }
 0x14d   : > { %v407_v54 = vadd.f32 0.5, %v403_v53 }
 0x14f   : > { %461 = vmatmul.f32.gmra.mxu3 %v407_v54  ;;  %490 = vmatmul.f32.vlgmr.msrb.gmra.mxu1 %v407_v54 }
 0x152   : > { %v663_v55 = vpop.eup %662 }
 0x153   : > { %v395_v56 = vpop.f32.mrf.mxu2  ;;  %v404_v57 = vmul.f32 0.5, %v663_v55 }
 0x154   : > { %664 = vtanh.f32 %v395_v56 }
 0x155   : > { %v408_v58 = vadd.f32 0.5, %v404_v57 }
 0x157   : > { %464 = vmatmul.f32.gmra.mxu3 %v408_v58  ;;  %493 = vmatmul.f32.gmra.mxu1 %v408_v58 }
 0x15a   : > { %v665_v59 = vpop.eup %664 }
 0x15b   : > { %v405_v60 = vmul.f32 0.5, %v665_v59 }
 0x15d   : > { %v409_v61 = vadd.f32 0.5, %v405_v60 }
 0x15f   : > { %467 = vmatmul.f32.gmra.mxu3 %v409_v61  ;;  %496 = vmatmul.f32.gmra.mxu1 %v409_v61 }
 0x1c4   : > { %v488_v62 = vpop.f32.mrf.mxu0 }
 0x1c5   : > { %666 = vtanh.f32 %v488_v62 }
 0x1ca   : > { %v459_v63 = vpop.f32.mrf.mxu3 }
 0x1cb   : > { %v667_v0 = vpop.eup %666  ;;  %668 = vtanh.f32 %v459_v63 }
 0x1cc   : > { %v509_v1 = vmul.f32 2.5, %v667_v0  ;;  %v491_v2 = vpop.f32.mrf.mxu1 }
 0x1cd   : > { %670 = vtanh.f32 %v491_v2 }
 0x1ce   : > { %672 = vtanh.f32 %v509_v1 }
 0x1d1   : > { %v669_v3 = vpop.eup %668 }
 0x1d2   : > { %v508_v4 = vmul.f32 2.5, %v669_v3  ;;  %v462_v5 = vpop.f32.mrf.mxu3 }
 0x1d3   : > { %v671_v6 = vpop.eup %670  ;;  %674 = vtanh.f32 %v462_v5 }
 0x1d4   : > { %v673_v7 = vpop.eup %672  ;;  %676 = vtanh.f32 %v508_v4  ;;  %v511_v8 = vmul.f32 2.5, %v671_v6  ;;  %v494_v9 = vpop.f32.mrf.mxu1 }
 0x1d5   : > { %v525_v10 = vmul.f32 0.5, %v673_v7  ;;  %678 = vtanh.f32 %v494_v9 }
 0x1d6   : > { %680 = vtanh.f32 %v511_v8 }
 0x1d7   : > { %v533_v11 = vadd.f32 0.5, %v525_v10 }
 0x1d9   : > { %v675_v12 = vpop.eup %674  ;;  %541 = vst.msk [vmem:[%s999_s19 + $0x8] sm:$0xff] %vm270_vm0, %v533_v11 }
 0x1da   : > { %v677_v13 = vpop.eup %676  ;;  %v510_v14 = vmul.f32 2.5, %v675_v12  ;;  %v465_v15 = vpop.f32.mrf.mxu3 }
 0x1db   : > { %v679_v16 = vpop.eup %678  ;;  %v524_v17 = vmul.f32 0.5, %v677_v13  ;;  %682 = vtanh.f32 %v465_v15 }
 0x1dc   : > { %v681_v18 = vpop.eup %680  ;;  %684 = vtanh.f32 %v510_v14  ;;  %v513_v19 = vmul.f32 2.5, %v679_v16  ;;  %v497_v20 = vpop.f32.mrf.mxu1 }
 0x1dd   : > { %v532_v21 = vadd.f32 0.5, %v524_v17  ;;  %v527_v22 = vmul.f32 0.5, %v681_v18  ;;  %686 = vtanh.f32 %v497_v20 }
 0x1de   : > { %688 = vtanh.f32 %v513_v19 }
 0x1df   : > { %540 = vst [vmem:[%s999_s19] sm:$0xff] %v532_v21  ;;  %v535_v23 = vadd.f32 0.5, %v527_v22 }
 0x1e1   : > { %v683_v24 = vpop.eup %682  ;;  %543 = vst.msk [vmem:[%s999_s19 + $0x18] sm:$0xff] %vm270_vm0, %v535_v23 }
 0x1e2   : > { %v685_v25 = vpop.eup %684  ;;  %v512_v26 = vmul.f32 2.5, %v683_v24  ;;  %v468_v27 = vpop.f32.mrf.mxu3 }
 0x1e3   : > { %v687_v28 = vpop.eup %686  ;;  %v526_v29 = vmul.f32 0.5, %v685_v25  ;;  %690 = vtanh.f32 %v468_v27 }
 0x1e4   : > { %v689_v30 = vpop.eup %688  ;;  %692 = vtanh.f32 %v512_v26  ;;  %v515_v31 = vmul.f32 2.5, %v687_v28 }
 0x1e5   : > { %v534_v32 = vadd.f32 0.5, %v526_v29  ;;  %v529_v33 = vmul.f32 0.5, %v689_v30 }
 0x1e6   : > { %694 = vtanh.f32 %v515_v31 }
 0x1e7   : > { %542 = vst [vmem:[%s999_s19 + $0x10] sm:$0xff] %v534_v32  ;;  %v537_v34 = vadd.f32 0.5, %v529_v33 }
 0x1e9   : > { %v691_v35 = vpop.eup %690  ;;  %545 = vst.msk [vmem:[%s999_s19 + $0x28] sm:$0xff] %vm270_vm0, %v537_v34 }
 0x1ea   : > { %v693_v36 = vpop.eup %692  ;;  %v514_v37 = vmul.f32 2.5, %v691_v35 }
 0x1eb   : > { %v528_v38 = vmul.f32 0.5, %v693_v36 }
 0x1ec   : > { %v695_v39 = vpop.eup %694  ;;  %696 = vtanh.f32 %v514_v37 }
 0x1ed   : > { %v536_v40 = vadd.f32 0.5, %v528_v38  ;;  %v531_v41 = vmul.f32 0.5, %v695_v39 }
 0x1ef   : > { %544 = vst [vmem:[%s999_s19 + $0x20] sm:$0xff] %v536_v40  ;;  %v539_v42 = vadd.f32 0.5, %v531_v41 }
 0x1f1   : > { %547 = vst.msk [vmem:[%s999_s19 + $0x38] sm:$0xff] %vm270_vm0, %v539_v42 }
 0x1f2   : > { %v697_v43 = vpop.eup %696 }
 0x1f3   : > { %v530_v44 = vmul.f32 0.5, %v697_v43 }
 0x1f5   : > { %v538_v45 = vadd.f32 0.5, %v530_v44 }
 0x1f7   : > { %546 = vst [vmem:[%s999_s19 + $0x30] sm:$0xff] %v538_v45 }
 0x1f8 PF: > { %s15_s18 = sadd.s32 1, %s704_s18  }
 0x1f9   : > { %p12_p4 = scmp.ge.s32.totalorder %s15_s18, 6  }
 0x1fb   :  { %14 = sbr.rel (!%p12_p4) target bundleno = 1 (0x1), region = 70 }

</bundles_post_ra>
